<compile_context>
chip_gen: v5e
topology: v5e:2x2
jax: 0.10.0
libtpu: 0.0.40
codegen_flags: <defaults>
</compile_context>

<pallas_src>
import math

import jax
import jax.numpy as jnp
from jax.experimental import pallas as pl
from jax.experimental.pallas import tpu as pltpu


def _decay_kernel(d_ref, w_ref, b_ref, o_ref):
    # d_ref: (TM, L)   w_ref: (1, L)   b_ref: (1, L)   o_ref: (TM, L)
    # lin = d * diag(W) + b  (broadcast along rows); compute in f32.
    lin = d_ref[...].astype(jnp.float32) * w_ref[...] + b_ref[...]
    # exp(-relu(lin)) == exp(min(-lin, 0)) — relu fused into the EUP exp,
    # never produces an inf intermediate.
    o_ref[...] = jnp.exp(jnp.minimum(-lin, 0.0)).astype(o_ref.dtype)


def input_temporal_decay(d, W, b, *, tile_rows=8192, out_dtype=None):
    """d: (..., input_size). Returns exp(-relu(linear(d, W*I, b)))."""
    orig_shape = d.shape
    K = orig_shape[-1]
    out_dtype = jnp.dtype(out_dtype) if out_dtype is not None else d.dtype

    # diag(W) is all that survives the identity mask; pass only K values.
    wdiag = jnp.diagonal(W).astype(jnp.float32)      # (K,)
    bias = b.reshape(-1).astype(jnp.float32)         # (K,)

    d2 = d.reshape(-1, K)                            # free (contiguous) reshape
    N = d2.shape[0]

    # Lane-dense packing: fold P consecutive rows into one row whose width is
    # a multiple of 128 so stores are full unmasked vst.  The reshape is free
    # (row-major contiguity) and diag(W)/b stay exact under periodic tiling.
    if K % 128 == 0:
        P = 1                                        # already lane-dense
    elif 128 % K == 0:
        P = 128 // K
    else:
        P = 128 // math.gcd(K, 128)                  # lane = lcm(K, 128)
        if P * K > 4096:
            P = 1                                    # keep lane width sane
    if N % P != 0:
        # Zero-copy fallback: masked stores inside the kernel are cheaper than
        # an extra full HBM pass for pad-concat + output slice.
        P = 1
    lane = P * K
    n_rows = N // P

    d_packed = d2.reshape(n_rows, lane)              # free reshape, no copy
    w_row = jnp.tile(wdiag, P).reshape(1, lane)
    b_row = jnp.tile(bias, P).reshape(1, lane)

    # ~2 MiB f32 pipeline blocks: >85% of HBM roofline, fits every chip's
    # scoped-VMEM default when double-buffered for input + output.
    target_block_bytes = 2 * 1024 * 1024
    tile = target_block_bytes // (lane * 4)
    tile = max(8, min(tile, tile_rows))
    tile = (tile // 8) * 8
    tile = min(tile, ((n_rows + 7) // 8) * 8)        # don't exceed the data
    grid = (pl.cdiv(n_rows, tile),)                  # partial last tile masked

    cost = pl.CostEstimate(
        flops=3 * N * K,
        transcendentals=N * K,
        bytes_accessed=N * K * (d.dtype.itemsize + out_dtype.itemsize),
    )

    out_packed = pl.pallas_call(
        _decay_kernel,
        out_shape=jax.ShapeDtypeStruct((n_rows, lane), out_dtype),
        grid_spec=pltpu.PrefetchScalarGridSpec(
            num_scalar_prefetch=0,
            grid=grid,
            in_specs=[
                pl.BlockSpec((tile, lane), lambda i: (i, 0)),  # d tile
                pl.BlockSpec((1, lane), lambda i: (0, 0)),     # diag(W), resident
                pl.BlockSpec((1, lane), lambda i: (0, 0)),     # b, resident
            ],
            out_specs=pl.BlockSpec((tile, lane), lambda i: (i, 0)),
        ),
        compiler_params=pltpu.CompilerParams(
            dimension_semantics=("parallel",),       # shards across v7x's 2 TCs
        ),
        cost_estimate=cost,
    )(d_packed, w_row, b_row)

    # n_rows * lane == N * K exactly (no padding) -> free reshape, no slice.
    return out_packed.reshape(orig_shape)


def reference(d, W, b):
    K = W.shape[0]
    w_masked = W * jnp.eye(K, dtype=W.dtype)
    gamma = jnp.maximum(d @ w_masked.T + b, 0.0)
    return jnp.exp(-gamma)


if __name__ == "__main__":
    key = jax.random.PRNGKey(0)
    ks = jax.random.split(key, 7)

    def make_params(k_w, k_b, K):
        # Deterministic init matching reset_parameters(): U(-stdv, stdv)
        stdv = 1.0 / math.sqrt(K)
        W = jax.random.uniform(k_w, (K, K), jnp.float32, minval=-stdv, maxval=stdv)
        b = jax.random.uniform(k_b, (K,), jnp.float32, minval=-stdv, maxval=stdv)
        return W, b

    # Case 1: input_size=32, (batch=2, seq=8) — lane-dense packed path (P=4).
    W32, b32 = make_params(ks[0], ks[1], 32)
    d1 = jax.random.uniform(ks[2], (2, 8, 32), jnp.float32, minval=0.0, maxval=5.0)
    out1 = jax.block_until_ready(input_temporal_decay(d1, W32, b32))
    assert out1.shape == d1.shape
    assert jnp.allclose(out1, reference(d1, W32, b32), atol=1e-5, rtol=1e-5)

    # Case 2: row count not divisible by packing factor — zero-copy P=1 path.
    d2 = jax.random.uniform(ks[3], (3, 5, 32), jnp.float32, minval=0.0, maxval=5.0)
    out2 = jax.block_until_ready(input_temporal_decay(d2, W32, b32))
    assert jnp.allclose(out2, reference(d2, W32, b32), atol=1e-5, rtol=1e-5)

    # Case 3: input_size=48 (doesn't divide 128) — lcm(K,128) packing (P=8).
    W48, b48 = make_params(ks[4], ks[5], 48)
    d3 = jax.random.uniform(ks[6], (2, 8, 48), jnp.float32, minval=0.0, maxval=5.0)
    out3 = jax.block_until_ready(input_temporal_decay(d3, W48, b48))
    assert jnp.allclose(out3, reference(d3, W48, b48), atol=1e-5, rtol=1e-5)

    print("KERNEL_OK")
</pallas_src>

<mosaic_0001>
module attributes {stable_mosaic.version = 11 : i64} {
  func.func @_decay_kernel(%arg0: i32, %arg1: memref<8x128xf32, #tpu.memory_space<vmem>>, %arg2: memref<1x128xf32, #tpu.memory_space<vmem>>, %arg3: memref<1x128xf32, #tpu.memory_space<vmem>>, %arg4: memref<8x128xf32, #tpu.memory_space<vmem>>) attributes {dimension_semantics = [#tpu.dimension_semantics<parallel>], iteration_bounds = array<i64: 1>, scalar_prefetch = 0 : i64, scratch_operands = 0 : i64, tpu.core_type = #tpu.core_type<tc>, window_params = [{transform_indices = @transform_0, window_bounds = array<i64: 8, 128>}, {pipeline_mode = #tpu.pipeline_mode<synchronous>, transform_indices = @transform_1, window_bounds = array<i64: 1, 128>}, {pipeline_mode = #tpu.pipeline_mode<synchronous>, transform_indices = @transform_2, window_bounds = array<i64: 1, 128>}, {transform_indices = @transform_3, window_bounds = array<i64: 8, 128>}]} {
    %c0 = arith.constant 0 : index
    %c0_0 = arith.constant 0 : index
    %0 = vector.load %arg1[%c0, %c0_0] : memref<8x128xf32, #tpu.memory_space<vmem>>, vector<8x128xf32>
    %c0_1 = arith.constant 0 : index
    %c0_2 = arith.constant 0 : index
    %1 = vector.load %arg2[%c0_1, %c0_2] : memref<1x128xf32, #tpu.memory_space<vmem>>, vector<1x128xf32>
    %2 = vector.broadcast %1 : vector<1x128xf32> to vector<8x128xf32>
    %3 = arith.mulf %0, %2 : vector<8x128xf32>
    %c0_3 = arith.constant 0 : index
    %c0_4 = arith.constant 0 : index
    %4 = vector.load %arg3[%c0_3, %c0_4] : memref<1x128xf32, #tpu.memory_space<vmem>>, vector<1x128xf32>
    %5 = vector.broadcast %4 : vector<1x128xf32> to vector<8x128xf32>
    %6 = arith.addf %3, %5 : vector<8x128xf32>
    %cst = arith.constant 0.000000e+00 : f32
    %7 = vector.broadcast %cst : f32 to vector<8x128xf32>
    %8 = arith.subf %7, %6 : vector<8x128xf32>
    %cst_5 = arith.constant 0.000000e+00 : f32
    %9 = vector.broadcast %cst_5 : f32 to vector<8x128xf32>
    %10 = arith.minimumf %8, %9 : vector<8x128xf32>
    %11 = math.exp %10 : vector<8x128xf32>
    %c0_6 = arith.constant 0 : index
    %c0_7 = arith.constant 0 : index
    %12 = vector.load %arg4[%c0_6, %c0_7] : memref<8x128xf32, #tpu.memory_space<vmem>>, vector<8x128xf32>
    tpu.vector_store %arg4[%c0_6, %c0_7], %11 {strides = array<i32>} : memref<8x128xf32, #tpu.memory_space<vmem>>, vector<8x128xf32>,
    return
  }
  func.func @transform_0(%arg0: i32) -> (i32, i32) {
    %c0_i32 = arith.constant 0 : i32
    %c0_i32_0 = arith.constant 0 : i32
    return %arg0, %c0_i32 : i32, i32
  }
  func.func @transform_1(%arg0: i32) -> (i32, i32) {
    %c0_i32 = arith.constant 0 : i32
    %c0_i32_0 = arith.constant 0 : i32
    %c0_i32_1 = arith.constant 0 : i32
    return %c0_i32, %c0_i32_0 : i32, i32
  }
  func.func @transform_2(%arg0: i32) -> (i32, i32) {
    %c0_i32 = arith.constant 0 : i32
    %c0_i32_0 = arith.constant 0 : i32
    %c0_i32_1 = arith.constant 0 : i32
    return %c0_i32, %c0_i32_0 : i32, i32
  }
  func.func @transform_3(%arg0: i32) -> (i32, i32) {
    %c0_i32 = arith.constant 0 : i32
    %c0_i32_0 = arith.constant 0 : i32
    return %arg0, %c0_i32 : i32, i32
  }
}

</mosaic_0001>

<bundles_post_ra>
// kernel: tpu_custom_call.1
= control target key start
LH: loop header
LB: loop body
LE: loop exit
PB: predicated region body
PF: predicated region fallthrough
CT: control target
= control target key end

     0   :  { %8 = vsyncpa [#allocation3], 0  ;;  %s211_s0 = inlined_call_operand.hbm [shape: f32[4,128], index: 0, kind: input, shape index: {}]   ;;  %s212_s1 = inlined_call_operand.hbm [shape: f32[1,128], index: 1, kind: input, shape index: {}]   ;;  %s213_s2 = inlined_call_operand.vmem [shape: f32[1,128], index: 2, kind: input, shape index: {}]   ;;  %s214_s3 = inlined_call_operand.hbm [shape: f32[4,128], index: 3, kind: output, shape index: {}]  }
   0x1   :  { %9 = vsyncpa [#allocation6], 0 }
   0x2   :  { %10 = vsyncpa [#allocation4], 0 }
   0x3   :  { %14 = vsyncadd [#allocation3], 64  ;;  %s15_s14 = sshll.u32 %s211_s0, 4  ;;  %s168_s15 = smov [#allocation2]   ;;  %s16_s14 = int_to_ptr.hbm [resolvable:$true] %s15_s14 }
   0x4   :  { %s17_s16 = sshll.u32 %s168_s15, 4  ;;  %s29_s19 = sshll.u32 %s212_s1, 4  ;;  %s18_s16 = int_to_ptr.vmem [resolvable:$true] %s17_s16  ;;  %s30_s19 = int_to_ptr.hbm [resolvable:$true] %s29_s19 }
   0x5   :  { %s169_s20 = smov 64   ;;  %s170_s21 = smov 4  }
   0x6   :  { %23 = dma.hbm_to_vmem [thread:$0]  %s16_s14, 64, %s18_s16, [#allocation3], %s169_s20, %s169_s20, %s170_s21  }
   0x7   :  { %s171_s22 = smov [#allocation5]  }
   0x8   :  { %s31_s23 = sshll.u32 %s171_s22, 4  ;;  %s32_s23 = int_to_ptr.vmem [resolvable:$true] %s31_s23 }
   0x9   :  { %34 = dma.hbm_to_vmem [thread:$0]  %s30_s19, 16, %s32_s23, [#allocation6]  }
   0xa   :  { %162 = dma.done.wait [#allocation3], 128  }
   0xb   :  { %163 = vsyncadd [#allocation3], 4294967168 }
   0xc   :  { %164 = dma.done.wait [#allocation6], 16  }
   0xd   :  { %165 = vsyncadd [#allocation6], 4294967280  ;;  %v45_v0 = vld [vmem:[#allocation2] sm:$0xff]  ;;  %v86_v1 = vld [vmem:[#allocation5] ss:$0 sm:$0xff] }
   0xe   :  { %v87_v2 = vld [vmem:[%s213_s2] ss:$0 sm:$0xff]  ;;  %v50_v3 = vmul.f32 %v86_v1, %v45_v0 }
  0x10   :  { %v55_v4 = vadd.f32 %v87_v2, %v50_v3 }
  0x12   :  { %v56_v5 = vsub.f32 0.0, %v55_v4 }
  0x14   :  { %v57_v6 = vmin.f32 %v56_v5, 0.0 }
  0x16   :  { %v58_v7 = vmul.f32 1.442695, %v57_v6 }
  0x18   :  { %88 = vpow2.f32 %v58_v7 }
  0x1e   :  { %v89_v8 = vpop.eup %88 }
  0x1f   :  { %60 = vst [vmem:[#allocation7] sm:$0xff] %v89_v8 }
  0x20   :  { %64 = vsyncadd [#allocation4], 64  ;;  %s67_s26 = sshll.u32 %s214_s3, 4  ;;  %s172_s27 = smov [#allocation7]   ;;  %s68_s26 = int_to_ptr.hbm [resolvable:$true] %s67_s26 }
  0x21   :  { %s65_s28 = sshll.u32 %s172_s27, 4  ;;  %s66_s28 = int_to_ptr.vmem [resolvable:$true] %s65_s28 }
  0x22   :  { %73 = dma.vmem_to_hbm [thread:$0]  %s66_s28, 64, %s68_s26, [#allocation4], %s169_s20, %s169_s20, %s170_s21  }
  0x23   :  { %166 = dma.done.wait [#allocation4], 128  }
  0x24   :  { %167 = vsyncadd [#allocation4], 4294967168 }
  0x25   :  { %78 = vsyncpa [#allocation3], 1 }
  0x26   :  { %79 = vsyncpa [#allocation6], 1 }
  0x27   :  { %80 = vsyncpa [#allocation4], 1 }

</bundles_post_ra>
